<compile_context>
chip_gen: v5e
topology: v5e:2x2
jax: 0.10.0
libtpu: 0.0.40
codegen_flags: <defaults>
</compile_context>

<pallas_src>
import jax
import jax.numpy as jnp
from jax.experimental import pallas as pl
from jax.experimental.pallas import tpu as pltpu


# ---------------------------------------------------------------------------
# helpers
# ---------------------------------------------------------------------------
def _round_up(x, m):
    return ((x + m - 1) // m) * m


def _vmem_limit_bytes():
    """Scoped-VMEM budget per generation: ~3/4 of physical VMEM, capped at
    100 MiB (v5e/v6e: 128 MiB physical -> 96 MiB, v7x: 64 MiB -> 48 MiB).
    Falls back to the smallest generation (v7x) if the query is unavailable."""
    cap = 64 * 1024 * 1024
    try:
        info = pltpu.get_tpu_info()
        cap = int(getattr(info, "vmem_capacity_bytes", cap) or cap)
    except Exception:
        pass
    return min((cap * 3) // 4, 100 * 1024 * 1024)


def _row_tile(n_rows, row_in_bytes, row_out_bytes, fixed_bytes, budget_bytes):
    """Rows per grid step.

    Accounts for double-buffering (x2 per pipelined input/output block) plus
    the VMEM-resident weights/biases (conservatively x2) and a small margin.
    Prefers MXU-friendly multiples of 128 (cap 512); floor is 8 rows (output
    block sublane requirement).  Halves the tile while it would leave fewer
    than 2 grid steps so both v7x TensorCores get work whenever the batch
    allows it."""
    rows8 = _round_up(max(n_rows, 1), 8)
    per_row = 2 * row_in_bytes + 2 * row_out_bytes           # double-buffered
    avail = budget_bytes - 2 * fixed_bytes - (2 << 20)       # resident w + margin
    tb = max(avail // max(per_row, 1), 8)                    # 8 = hard sublane floor
    tb = min(tb, 512, rows8)
    tb = (tb // 128) * 128 if tb >= 128 else (tb // 8) * 8   # lane/MXU friendly
    tb = max(tb, 8)
    while tb > 8 and pl.cdiv(rows8, tb) < 2:                 # feed both TCs
        tb = max(((tb // 2) // 8) * 8, 8)
    return tb


# ---------------------------------------------------------------------------
# Kernel 1: fused context path
#   grid = (row_tiles, U); U is a reduction axis for the projector.
#   x_ref  : [TB, S, H] bf16   u-th utterance of a row tile (U dim Squeezed)
#   ew_ref : [H, H]  bf16      pooler weight pre-scaled by 1/S (VMEM-resident)
#   eb_ref : [1, H]  f32       pooler bias (resident)
#   pw_ref : [U, H, Pp] bf16   full context projector weight (resident)
#   pb_ref : [1, Pp] f32       context projector bias (resident)
#   o_ref  : [TB, Pp] f32      projected context encoding; block index (b, 0)
#                              is constant over u -> accumulated in VMEM.
# ---------------------------------------------------------------------------
def _ctx_kernel(x_ref, ew_ref, eb_ref, pw_ref, pb_ref, o_ref):
    u = pl.program_id(1)

    @pl.when(u == 0)
    def _():
        o_ref[...] = jnp.broadcast_to(pb_ref[...], o_ref.shape)

    pooled = jnp.sum(x_ref[...].astype(jnp.float32), axis=1)      # f32 sum-pool
    enc = jnp.tanh(
        jnp.dot(pooled.astype(jnp.bfloat16), ew_ref[...],
                preferred_element_type=jnp.float32) + eb_ref[...])
    # ContextEncoderConcat + Projector folded:  ce @ W == sum_u enc_u @ W[u]
    o_ref[...] += jnp.dot(enc.astype(jnp.bfloat16), pw_ref[u],
                          preferred_element_type=jnp.float32)


# ---------------------------------------------------------------------------
# Kernel 2: fused target path (encode + project in one pass)
# ---------------------------------------------------------------------------
def _tgt_kernel(x_ref, ew_ref, eb_ref, pw_ref, pb_ref, o_ref):
    pooled = jnp.sum(x_ref[...].astype(jnp.float32), axis=1)      # [TB, H] f32
    enc = jnp.tanh(
        jnp.dot(pooled.astype(jnp.bfloat16), ew_ref[...],
                preferred_element_type=jnp.float32) + eb_ref[...])
    o_ref[...] = jnp.dot(enc.astype(jnp.bfloat16), pw_ref[...],
                         preferred_element_type=jnp.float32) + pb_ref[...]


# ---------------------------------------------------------------------------
# pallas_call wrappers
# ---------------------------------------------------------------------------
def _context_call(x, enc_w, enc_b, pw, pb, tb, vmem_limit):
    Bp, U, S, H = x.shape
    Pp = pw.shape[-1]
    grid = (Bp // tb, U)
    return pl.pallas_call(
        _ctx_kernel,
        out_shape=jax.ShapeDtypeStruct((Bp, Pp), jnp.float32),
        grid_spec=pltpu.PrefetchScalarGridSpec(
            num_scalar_prefetch=0,
            grid=grid,
            in_specs=[
                pl.BlockSpec((tb, pl.Squeezed(), S, H),
                             lambda b, u: (b, u, 0, 0)),
                pl.BlockSpec((H, H), lambda b, u: (0, 0)),
                pl.BlockSpec((1, H), lambda b, u: (0, 0)),
                pl.BlockSpec((U, H, Pp), lambda b, u: (0, 0, 0)),
                pl.BlockSpec((1, Pp), lambda b, u: (0, 0)),
            ],
            out_specs=pl.BlockSpec((tb, Pp), lambda b, u: (b, 0)),
        ),
        compiler_params=pltpu.CompilerParams(
            dimension_semantics=("parallel", "arbitrary"),
            vmem_limit_bytes=vmem_limit),
        cost_estimate=pl.CostEstimate(
            flops=2 * Bp * U * H * (H + Pp),
            transcendentals=Bp * U * H,
            bytes_accessed=(Bp * U * S * H * 2 + Bp * Pp * 4
                            + H * H * 2 + U * H * Pp * 2)),
    )(x, enc_w, enc_b, pw, pb)


def _target_call(x, enc_w, enc_b, pw, pb, tb, vmem_limit):
    Bp, S, H = x.shape
    Pp = pw.shape[-1]
    grid = (Bp // tb,)
    return pl.pallas_call(
        _tgt_kernel,
        out_shape=jax.ShapeDtypeStruct((Bp, Pp), jnp.float32),
        grid_spec=pltpu.PrefetchScalarGridSpec(
            num_scalar_prefetch=0,
            grid=grid,
            in_specs=[
                pl.BlockSpec((tb, S, H), lambda b: (b, 0, 0)),
                pl.BlockSpec((H, H), lambda b: (0, 0)),
                pl.BlockSpec((1, H), lambda b: (0, 0)),
                pl.BlockSpec((H, Pp), lambda b: (0, 0)),
                pl.BlockSpec((1, Pp), lambda b: (0, 0)),
            ],
            out_specs=pl.BlockSpec((tb, Pp), lambda b: (b, 0)),
        ),
        compiler_params=pltpu.CompilerParams(
            dimension_semantics=("parallel",),
            vmem_limit_bytes=vmem_limit),
        cost_estimate=pl.CostEstimate(
            flops=2 * Bp * H * (H + Pp),
            transcendentals=Bp * H,
            bytes_accessed=(Bp * S * H * 2 + Bp * Pp * 4
                            + H * H * 2 + H * Pp * 2)),
    )(x, enc_w, enc_b, pw, pb)


# ---------------------------------------------------------------------------
# one-time parameter preprocessing (hoisted out of the forward path)
# ---------------------------------------------------------------------------
def preprocess_params(params, S):
    """bf16 MXU operands (biases stay f32), pooler weight pre-scaled by 1/S
    (kernels use sum-pool), projector outputs padded to a lane-dense multiple
    of 128, ctx projector weight reshaped to [U, H, Pp] for per-u indexing."""
    H = params["enc_w"].shape[0]
    P = params["ctx_proj_b"].shape[-1]
    U = params["ctx_proj_w"].shape[0] // H
    Pp = _round_up(P, 128)
    pad_p = ((0, 0), (0, Pp - P))
    return {
        "enc_w": (params["enc_w"] / float(S)).astype(jnp.bfloat16),
        "enc_b": params["enc_b"].astype(jnp.float32),
        "ctx_proj_w": jnp.pad(
            params["ctx_proj_w"].reshape(U, H, P).astype(jnp.bfloat16),
            ((0, 0), (0, 0), (0, Pp - P))),
        "ctx_proj_b": jnp.pad(params["ctx_proj_b"].astype(jnp.float32), pad_p),
        "tgt_proj_w": jnp.pad(params["tgt_proj_w"].astype(jnp.bfloat16), pad_p),
        "tgt_proj_b": jnp.pad(params["tgt_proj_b"].astype(jnp.float32), pad_p),
    }


# ---------------------------------------------------------------------------
# Pairwise.forward
#   context_x : [B, U, S, H]  (U context utterances per pair, already embedded)
#   target_x  : [B, S, H]
# returns (context_encodings [B, P], target_encodings [B, P])
# Projector dropout is eval-mode (identity).
# ---------------------------------------------------------------------------
def pairwise_forward(prep, context_x, target_x, projection_size):
    B, U, S, H = context_x.shape
    Pp = prep["ctx_proj_b"].shape[-1]
    vmem_limit = _vmem_limit_bytes()

    # HBM-bound on the token embeddings -> ship them as bf16; all pooling /
    # matmul accumulation stays f32 inside the kernels.
    ctx_x = context_x.astype(jnp.bfloat16)
    tgt_x = target_x.astype(jnp.bfloat16)

    # --- context: fused ContextEncoderConcat + context_projector ---
    fixed_ctx = H * H * 2 + H * 4 + U * H * Pp * 2 + Pp * 4
    tb_c = _row_tile(B, S * H * 2, Pp * 4, fixed_ctx, vmem_limit)
    Bp_c = _round_up(B, tb_c)
    ctx_x = jnp.pad(ctx_x, ((0, Bp_c - B), (0, 0), (0, 0), (0, 0)))
    ctx_out = _context_call(ctx_x, prep["enc_w"], prep["enc_b"],
                            prep["ctx_proj_w"], prep["ctx_proj_b"],
                            tb_c, vmem_limit)

    # --- target: fused TargetEncoder + target_projector ---
    fixed_tgt = H * H * 2 + H * 4 + H * Pp * 2 + Pp * 4
    tb_t = _row_tile(B, S * H * 2, Pp * 4, fixed_tgt, vmem_limit)
    Bp_t = _round_up(B, tb_t)
    tgt_x = jnp.pad(tgt_x, ((0, Bp_t - B), (0, 0), (0, 0)))
    tgt_out = _target_call(tgt_x, prep["enc_w"], prep["enc_b"],
                           prep["tgt_proj_w"], prep["tgt_proj_b"],
                           tb_t, vmem_limit)

    return ctx_out[:B, :projection_size], tgt_out[:B, :projection_size]


def init_params(key, H, U, P):
    ks = jax.random.split(key, 6)
    scale = 0.02
    return {
        "enc_w":      scale * jax.random.normal(ks[0], (H, H), jnp.float32),
        "enc_b":      scale * jax.random.normal(ks[1], (1, H), jnp.float32),
        "ctx_proj_w": scale * jax.random.normal(ks[2], (U * H, P), jnp.float32),
        "ctx_proj_b": scale * jax.random.normal(ks[3], (1, P), jnp.float32),
        "tgt_proj_w": scale * jax.random.normal(ks[4], (H, P), jnp.float32),
        "tgt_proj_b": scale * jax.random.normal(ks[5], (1, P), jnp.float32),
    }


if __name__ == "__main__":
    # small shapes: batch=2 pairs, 3 context utterances, seq=8, hidden=32, proj=16
    B, U, S, H, P = 2, 3, 8, 32, 16

    key = jax.random.PRNGKey(0)
    k_ctx, k_tgt, k_par = jax.random.split(key, 3)

    context_x = jax.random.normal(k_ctx, (B, U, S, H), jnp.float32)
    target_x = jax.random.normal(k_tgt, (B, S, H), jnp.float32)
    params = init_params(k_par, H, U, P)

    prep = preprocess_params(params, S)     # one-time cast/pad/pre-scale
    fwd = jax.jit(pairwise_forward, static_argnames=("projection_size",))
    ctx_out, tgt_out = fwd(prep, context_x, target_x, projection_size=P)
    jax.block_until_ready((ctx_out, tgt_out))

    # reference check (pure f32 JAX); kernel uses bf16 inputs/MXU operands
    # with f32 accumulation -> looser tolerance.
    def ref(params, cx, tx):
        def enc(x):
            return jnp.tanh(jnp.mean(x, axis=1) @ params["enc_w"] + params["enc_b"])
        te = enc(tx)
        ce = enc(cx.reshape(B * U, S, H)).reshape(B, U * H)
        return (ce @ params["ctx_proj_w"] + params["ctx_proj_b"],
                te @ params["tgt_proj_w"] + params["tgt_proj_b"])

    rc, rt = ref(params, context_x, target_x)
    assert ctx_out.shape == (B, P) and tgt_out.shape == (B, P)
    assert jnp.allclose(ctx_out, rc, atol=2e-3, rtol=2e-2), "context projection mismatch"
    assert jnp.allclose(tgt_out, rt, atol=2e-3, rtol=2e-2), "target projection mismatch"

    print("KERNEL_OK")
</pallas_src>

<mosaic_0001>
module attributes {stable_mosaic.version = 11 : i64} {
  func.func @_ctx_kernel(%arg0: i32, %arg1: i32, %arg2: memref<8x1x8x32xbf16, #tpu.memory_space<vmem>>, %arg3: memref<32x32xbf16, #tpu.memory_space<vmem>>, %arg4: memref<1x32xf32, #tpu.memory_space<vmem>>, %arg5: memref<3x32x128xbf16, #tpu.memory_space<vmem>>, %arg6: memref<1x128xf32, #tpu.memory_space<vmem>>, %arg7: memref<8x128xf32, #tpu.memory_space<vmem>>) attributes {dimension_semantics = [#tpu.dimension_semantics<parallel>, #tpu.dimension_semantics<arbitrary>], iteration_bounds = array<i64: 1, 3>, scalar_prefetch = 0 : i64, scratch_operands = 0 : i64, tpu.core_type = #tpu.core_type<tc>, window_params = [{transform_indices = @transform_0, window_bounds = array<i64: 8, 1, 8, 32>}, {pipeline_mode = #tpu.pipeline_mode<synchronous>, transform_indices = @transform_1, window_bounds = array<i64: 32, 32>}, {pipeline_mode = #tpu.pipeline_mode<synchronous>, transform_indices = @transform_2, window_bounds = array<i64: 1, 32>}, {pipeline_mode = #tpu.pipeline_mode<synchronous>, transform_indices = @transform_3, window_bounds = array<i64: 3, 32, 128>}, {pipeline_mode = #tpu.pipeline_mode<synchronous>, transform_indices = @transform_4, window_bounds = array<i64: 1, 128>}, {transform_indices = @transform_5, window_bounds = array<i64: 8, 128>}]} {
    %c0_i32 = arith.constant 0 : i32
    %0 = arith.cmpi eq, %arg1, %c0_i32 : i32
    %1 = arith.extui %0 : i1 to i32
    %c0_i32_0 = arith.constant 0 : i32
    %2 = arith.cmpi ne, %1, %c0_i32_0 : i32
    scf.if %2 {
      %c0_16 = arith.constant 0 : index
      %c0_17 = arith.constant 0 : index
      %22 = vector.load %arg6[%c0_16, %c0_17] : memref<1x128xf32, #tpu.memory_space<vmem>>, vector<1x128xf32>
      %23 = vector.shape_cast %22 : vector<1x128xf32> to vector<1x128xf32>
      %24 = vector.broadcast %23 : vector<1x128xf32> to vector<8x128xf32>
      %c0_18 = arith.constant 0 : index
      %c0_19 = arith.constant 0 : index
      %25 = vector.load %arg7[%c0_18, %c0_19] : memref<8x128xf32, #tpu.memory_space<vmem>>, vector<8x128xf32>
      tpu.vector_store %arg7[%c0_18, %c0_19], %24 {strides = array<i32>} : memref<8x128xf32, #tpu.memory_space<vmem>>, vector<8x128xf32>,
    } else {
    }
    %c0 = arith.constant 0 : index
    %c0_1 = arith.constant 0 : index
    %c0_2 = arith.constant 0 : index
    %c0_3 = arith.constant 0 : index
    %3 = vector.load %arg2[%c0, %c0_1, %c0_2, %c0_3] : memref<8x1x8x32xbf16, #tpu.memory_space<vmem>>, vector<8x1x8x32xbf16>
    %4 = vector.shape_cast %3 : vector<8x1x8x32xbf16> to vector<8x8x32xbf16>
    %5 = arith.extf %4 : vector<8x8x32xbf16> to vector<8x8x32xf32>
    %cst = arith.constant dense<0.000000e+00> : vector<8x32xf32>
    %6 = vector.multi_reduction <add>, %5, %cst [1] : vector<8x8x32xf32> to vector<8x32xf32>
    %7 = arith.truncf %6 : vector<8x32xf32> to vector<8x32xbf16>
    %c0_4 = arith.constant 0 : index
    %c0_5 = arith.constant 0 : index
    %8 = vector.load %arg3[%c0_4, %c0_5] : memref<32x32xbf16, #tpu.memory_space<vmem>>, vector<32x32xbf16>
    %cst_6 = arith.constant dense<0.000000e+00> : vector<8x32xf32>
    %9 = tpu.matmul %7, %8, %cst_6 {dimension_numbers = #tpu.dot_dimension_numbers<[1], [0], [0], [1], [0, 0, 1, 1], [], []>} : vector<8x32xbf16>, vector<32x32xbf16>, vector<8x32xf32> -> vector<8x32xf32>
    %c0_7 = arith.constant 0 : index
    %c0_8 = arith.constant 0 : index
    %10 = vector.load %arg4[%c0_7, %c0_8] : memref<1x32xf32, #tpu.memory_space<vmem>>, vector<1x32xf32>
    %11 = vector.broadcast %10 : vector<1x32xf32> to vector<8x32xf32>
    %12 = arith.addf %9, %11 : vector<8x32xf32>
    %13 = math.tanh %12 : vector<8x32xf32>
    %c0_9 = arith.constant 0 : index
    %c0_10 = arith.constant 0 : index
    %14 = vector.load %arg7[%c0_9, %c0_10] : memref<8x128xf32, #tpu.memory_space<vmem>>, vector<8x128xf32>
    %15 = arith.truncf %13 : vector<8x32xf32> to vector<8x32xbf16>
    %16 = arith.index_cast %arg1 : i32 to index
    %c0_11 = arith.constant 0 : index
    %c0_12 = arith.constant 0 : index
    %17 = vector.load %arg5[%16, %c0_11, %c0_12] : memref<3x32x128xbf16, #tpu.memory_space<vmem>>, vector<1x32x128xbf16>
    %18 = vector.shape_cast %17 : vector<1x32x128xbf16> to vector<32x128xbf16>
    %cst_13 = arith.constant dense<0.000000e+00> : vector<8x128xf32>
    %19 = tpu.matmul %15, %18, %cst_13 {dimension_numbers = #tpu.dot_dimension_numbers<[1], [0], [0], [1], [0, 0, 1, 1], [], []>} : vector<8x32xbf16>, vector<32x128xbf16>, vector<8x128xf32> -> vector<8x128xf32>
    %20 = arith.addf %14, %19 : vector<8x128xf32>
    %c0_14 = arith.constant 0 : index
    %c0_15 = arith.constant 0 : index
    %21 = vector.load %arg7[%c0_14, %c0_15] : memref<8x128xf32, #tpu.memory_space<vmem>>, vector<8x128xf32>
    tpu.vector_store %arg7[%c0_14, %c0_15], %20 {strides = array<i32>} : memref<8x128xf32, #tpu.memory_space<vmem>>, vector<8x128xf32>,
    return
  }
  func.func @transform_0(%arg0: i32, %arg1: i32) -> (i32, i32, i32, i32) {
    %c0_i32 = arith.constant 0 : i32
    %c0_i32_0 = arith.constant 0 : i32
    %c0_i32_1 = arith.constant 0 : i32
    return %arg0, %arg1, %c0_i32, %c0_i32_0 : i32, i32, i32, i32
  }
  func.func @transform_1(%arg0: i32, %arg1: i32) -> (i32, i32) {
    %c0_i32 = arith.constant 0 : i32
    %c0_i32_0 = arith.constant 0 : i32
    %c0_i32_1 = arith.constant 0 : i32
    return %c0_i32, %c0_i32_0 : i32, i32
  }
  func.func @transform_2(%arg0: i32, %arg1: i32) -> (i32, i32) {
    %c0_i32 = arith.constant 0 : i32
    %c0_i32_0 = arith.constant 0 : i32
    %c0_i32_1 = arith.constant 0 : i32
    return %c0_i32, %c0_i32_0 : i32, i32
  }
  func.func @transform_3(%arg0: i32, %arg1: i32) -> (i32, i32, i32) {
    %c0_i32 = arith.constant 0 : i32
    %c0_i32_0 = arith.constant 0 : i32
    %c0_i32_1 = arith.constant 0 : i32
    %c0_i32_2 = arith.constant 0 : i32
    return %c0_i32, %c0_i32_0, %c0_i32_1 : i32, i32, i32
  }
  func.func @transform_4(%arg0: i32, %arg1: i32) -> (i32, i32) {
    %c0_i32 = arith.constant 0 : i32
    %c0_i32_0 = arith.constant 0 : i32
    %c0_i32_1 = arith.constant 0 : i32
    return %c0_i32, %c0_i32_0 : i32, i32
  }
  func.func @transform_5(%arg0: i32, %arg1: i32) -> (i32, i32) {
    %c0_i32 = arith.constant 0 : i32
    %c0_i32_0 = arith.constant 0 : i32
    return %arg0, %c0_i32 : i32, i32
  }
}

module attributes {stable_mosaic.version = 11 : i64} {
  func.func @_tgt_kernel(%arg0: i32, %arg1: memref<8x8x32xbf16, #tpu.memory_space<vmem>>, %arg2: memref<32x32xbf16, #tpu.memory_space<vmem>>, %arg3: memref<1x32xf32, #tpu.memory_space<vmem>>, %arg4: memref<32x128xbf16, #tpu.memory_space<vmem>>, %arg5: memref<1x128xf32, #tpu.memory_space<vmem>>, %arg6: memref<8x128xf32, #tpu.memory_space<vmem>>) attributes {dimension_semantics = [#tpu.dimension_semantics<parallel>], iteration_bounds = array<i64: 1>, scalar_prefetch = 0 : i64, scratch_operands = 0 : i64, tpu.core_type = #tpu.core_type<tc>, window_params = [{transform_indices = @transform_0, window_bounds = array<i64: 8, 8, 32>}, {pipeline_mode = #tpu.pipeline_mode<synchronous>, transform_indices = @transform_1, window_bounds = array<i64: 32, 32>}, {pipeline_mode = #tpu.pipeline_mode<synchronous>, transform_indices = @transform_2, window_bounds = array<i64: 1, 32>}, {pipeline_mode = #tpu.pipeline_mode<synchronous>, transform_indices = @transform_3, window_bounds = array<i64: 32, 128>}, {pipeline_mode = #tpu.pipeline_mode<synchronous>, transform_indices = @transform_4, window_bounds = array<i64: 1, 128>}, {transform_indices = @transform_5, window_bounds = array<i64: 8, 128>}]} {
    %c0 = arith.constant 0 : index
    %c0_0 = arith.constant 0 : index
    %c0_1 = arith.constant 0 : index
    %0 = vector.load %arg1[%c0, %c0_0, %c0_1] : memref<8x8x32xbf16, #tpu.memory_space<vmem>>, vector<8x8x32xbf16>
    %1 = arith.extf %0 : vector<8x8x32xbf16> to vector<8x8x32xf32>
    %cst = arith.constant dense<0.000000e+00> : vector<8x32xf32>
    %2 = vector.multi_reduction <add>, %1, %cst [1] : vector<8x8x32xf32> to vector<8x32xf32>
    %3 = arith.truncf %2 : vector<8x32xf32> to vector<8x32xbf16>
    %c0_2 = arith.constant 0 : index
    %c0_3 = arith.constant 0 : index
    %4 = vector.load %arg2[%c0_2, %c0_3] : memref<32x32xbf16, #tpu.memory_space<vmem>>, vector<32x32xbf16>
    %cst_4 = arith.constant dense<0.000000e+00> : vector<8x32xf32>
    %5 = tpu.matmul %3, %4, %cst_4 {dimension_numbers = #tpu.dot_dimension_numbers<[1], [0], [0], [1], [0, 0, 1, 1], [], []>} : vector<8x32xbf16>, vector<32x32xbf16>, vector<8x32xf32> -> vector<8x32xf32>
    %c0_5 = arith.constant 0 : index
    %c0_6 = arith.constant 0 : index
    %6 = vector.load %arg3[%c0_5, %c0_6] : memref<1x32xf32, #tpu.memory_space<vmem>>, vector<1x32xf32>
    %7 = vector.broadcast %6 : vector<1x32xf32> to vector<8x32xf32>
    %8 = arith.addf %5, %7 : vector<8x32xf32>
    %9 = math.tanh %8 : vector<8x32xf32>
    %10 = arith.truncf %9 : vector<8x32xf32> to vector<8x32xbf16>
    %c0_7 = arith.constant 0 : index
    %c0_8 = arith.constant 0 : index
    %11 = vector.load %arg4[%c0_7, %c0_8] : memref<32x128xbf16, #tpu.memory_space<vmem>>, vector<32x128xbf16>
    %cst_9 = arith.constant dense<0.000000e+00> : vector<8x128xf32>
    %12 = tpu.matmul %10, %11, %cst_9 {dimension_numbers = #tpu.dot_dimension_numbers<[1], [0], [0], [1], [0, 0, 1, 1], [], []>} : vector<8x32xbf16>, vector<32x128xbf16>, vector<8x128xf32> -> vector<8x128xf32>
    %c0_10 = arith.constant 0 : index
    %c0_11 = arith.constant 0 : index
    %13 = vector.load %arg5[%c0_10, %c0_11] : memref<1x128xf32, #tpu.memory_space<vmem>>, vector<1x128xf32>
    %14 = vector.broadcast %13 : vector<1x128xf32> to vector<8x128xf32>
    %15 = arith.addf %12, %14 : vector<8x128xf32>
    %c0_12 = arith.constant 0 : index
    %c0_13 = arith.constant 0 : index
    %16 = vector.load %arg6[%c0_12, %c0_13] : memref<8x128xf32, #tpu.memory_space<vmem>>, vector<8x128xf32>
    tpu.vector_store %arg6[%c0_12, %c0_13], %15 {strides = array<i32>} : memref<8x128xf32, #tpu.memory_space<vmem>>, vector<8x128xf32>,
    return
  }
  func.func @transform_0(%arg0: i32) -> (i32, i32, i32) {
    %c0_i32 = arith.constant 0 : i32
    %c0_i32_0 = arith.constant 0 : i32
    %c0_i32_1 = arith.constant 0 : i32
    return %arg0, %c0_i32, %c0_i32_0 : i32, i32, i32
  }
  func.func @transform_1(%arg0: i32) -> (i32, i32) {
    %c0_i32 = arith.constant 0 : i32
    %c0_i32_0 = arith.constant 0 : i32
    %c0_i32_1 = arith.constant 0 : i32
    return %c0_i32, %c0_i32_0 : i32, i32
  }
  func.func @transform_2(%arg0: i32) -> (i32, i32) {
    %c0_i32 = arith.constant 0 : i32
    %c0_i32_0 = arith.constant 0 : i32
    %c0_i32_1 = arith.constant 0 : i32
    return %c0_i32, %c0_i32_0 : i32, i32
  }
  func.func @transform_3(%arg0: i32) -> (i32, i32) {
    %c0_i32 = arith.constant 0 : i32
    %c0_i32_0 = arith.constant 0 : i32
    %c0_i32_1 = arith.constant 0 : i32
    return %c0_i32, %c0_i32_0 : i32, i32
  }
  func.func @transform_4(%arg0: i32) -> (i32, i32) {
    %c0_i32 = arith.constant 0 : i32
    %c0_i32_0 = arith.constant 0 : i32
    %c0_i32_1 = arith.constant 0 : i32
    return %c0_i32, %c0_i32_0 : i32, i32
  }
  func.func @transform_5(%arg0: i32) -> (i32, i32) {
    %c0_i32 = arith.constant 0 : i32
    %c0_i32_0 = arith.constant 0 : i32
    return %arg0, %c0_i32 : i32, i32
  }
}

</mosaic_0001>

<bundles_post_ra>
// kernel: pairwise_forward.3
= control target key start
LH: loop header
LB: loop body
LE: loop exit
PB: predicated region body
PF: predicated region fallthrough
CT: control target
= control target key end

     0   :  { %vm37_vm0 = vcmask 261120   ;;  %vm126_vm1 = vcmask 1041409   ;;  %vm128_vm2 = vcmask 1042434   ;;  %vm130_vm3 = vcmask 1043459   ;;  %s333_s1 = inlined_call_operand.vmem [shape: bf16[32,32], index: 1, kind: input, shape index: {}]   ;;  %s334_s0 = inlined_call_operand.vmem [shape: bf16[8,8,32], index: 0, kind: input, shape index: {}]   ;;  %s335_s2 = inlined_call_operand.vmem [shape: f32[1,32], index: 2, kind: input, shape index: {}]   ;;  %s336_s4 = inlined_call_operand.vmem [shape: f32[1,128], index: 4, kind: input, shape index: {}]   ;;  %s337_s3 = inlined_call_operand.vmem [shape: bf16[32,128], index: 3, kind: input, shape index: {}]   ;;  %s338_s5 = inlined_call_operand.vmem [shape: f32[8,128], index: 5, kind: output, shape index: {}]  }
   0x1   :  { %v231_v0 = vld [vmem:[%s333_s1 + $0x8] sm:$0xff]  ;;  %v235_v1 = vld [vmem:[%s334_s0] sm:$0xff]   ;;  %v251_v5 = vld [vmem:[%s334_s0 + $0x10] sm:$0xff]   ;;  %vm132_vm4 = vcmask 1044484   ;;  %vm134_vm5 = vcmask 1045509   ;;  %vm136_vm6 = vcmask 1046534  }
   0x2   :  { %v236_v2 = vunpack.c.l.bf16 %v235_v1  ;;  %v237_v3 = vunpack.c.h.bf16 %v235_v1  ;;  %v250_v4 = vld [vmem:[%s334_s0 + $0x8] sm:$0xff]   ;;  %v252_v6 = vld [vmem:[%s334_s0 + $0x18] sm:$0xff]   ;;  %162 = vmatpush.bf16.msra.mxu0 %v231_v0  ;;  %v230_v7 = vld [vmem:[%s333_s1] sm:$0xff]  ;;  %v244_v10 = vunpack.c.l.bf16 %v251_v5  ;;  %v245_v11 = vunpack.c.h.bf16 %v251_v5 }
   0x3   :  { %v240_v8 = vunpack.c.l.bf16 %v250_v4  ;;  %v241_v9 = vunpack.c.h.bf16 %v250_v4  ;;  %v248_v12 = vunpack.c.l.bf16 %v252_v6  ;;  %v249_v13 = vunpack.c.h.bf16 %v252_v6 }
   0x4   :  { %v38_v14 = vsel %vm37_vm0, %v236_v2, 0.0  ;;  %v45_v15 = vsel %vm37_vm0, %v237_v3, 0.0  ;;  %v66_v22 = vsel %vm37_vm0, %v244_v10, 0.0  ;;  %v73_v23 = vsel %vm37_vm0, %v245_v11, 0.0 }
   0x5   :  { %v39_v16 = vrot.slane %v38_v14, 4  ;;  %v46_v17 = vrot.slane %v45_v15, 4  ;;  %v52_v18 = vsel %vm37_vm0, %v240_v8, 0.0  ;;  %v59_v19 = vsel %vm37_vm0, %v241_v9, 0.0 }
   0x6   :  { %v53_v20 = vrot.slane %v52_v18, 4  ;;  %v60_v21 = vrot.slane %v59_v19, 4  ;;  %163 = vmatpush.bf16.msra.mxu0 %v230_v7  ;;  %v67_v26 = vrot.slane %v66_v22, 4  ;;  %v74_v27 = vrot.slane %v73_v23, 4 }
   0x7   :  { %v40_v24 = vadd.f32 %v39_v16, %v38_v14  ;;  %v47_v25 = vadd.f32 %v46_v17, %v45_v15  ;;  %v80_v30 = vsel %vm37_vm0, %v248_v12, 0.0  ;;  %v87_v31 = vsel %vm37_vm0, %v249_v13, 0.0 }
   0x8   :  { %v54_v28 = vadd.f32 %v53_v20, %v52_v18  ;;  %v61_v29 = vadd.f32 %v60_v21, %v59_v19  ;;  %v68_v34 = vadd.f32 %v67_v26, %v66_v22  ;;  %v75_v35 = vadd.f32 %v74_v27, %v73_v23 }
   0x9   :  { %v41_v32 = vrot.slane %v40_v24, 2  ;;  %v48_v33 = vrot.slane %v47_v25, 2  ;;  %v81_v38 = vrot.slane %v80_v30, 4  ;;  %v88_v39 = vrot.slane %v87_v31, 4 }
   0xa   :  { %v55_v36 = vrot.slane %v54_v28, 2  ;;  %v62_v37 = vrot.slane %v61_v29, 2  ;;  %v69_v42 = vrot.slane %v68_v34, 2  ;;  %v76_v43 = vrot.slane %v75_v35, 2 }
   0xb   :  { %v42_v40 = vadd.f32 %v41_v32, %v40_v24  ;;  %v49_v41 = vadd.f32 %v48_v33, %v47_v25  ;;  %v82_v46 = vadd.f32 %v81_v38, %v80_v30  ;;  %v89_v47 = vadd.f32 %v88_v39, %v87_v31  ;;  %v233_v30 = vld [vmem:[%s337_s3 + $0x8] sm:$0xff]  ;;  %v232_v31 = vld [vmem:[%s337_s3] sm:$0xff] }
   0xc   :  { %v56_v44 = vadd.f32 %v55_v36, %v54_v28  ;;  %v63_v45 = vadd.f32 %v62_v37, %v61_v29  ;;  %v70_v50 = vadd.f32 %v69_v42, %v68_v34  ;;  %v77_v51 = vadd.f32 %v76_v43, %v75_v35  ;;  %200 = vmatpush.bf16.msra.mxu1 %v233_v30  ;;  %v253_v32 = vld [vmem:[%s335_s2] ss:$0 sm:$0xff] }
   0xd   :  { %v43_v48 = vrot.slane %v42_v40, 1  ;;  %v50_v49 = vrot.slane %v49_v41, 1  ;;  %v83_v54 = vrot.slane %v82_v46, 2  ;;  %v90_v55 = vrot.slane %v89_v47, 2  ;;  %v254_v38 = vld [vmem:[%s336_s4] ss:$0 sm:$0xff] }
   0xe   :  { %v57_v52 = vrot.slane %v56_v44, 1  ;;  %v64_v53 = vrot.slane %v63_v45, 1  ;;  %v71_v58 = vrot.slane %v70_v50, 1  ;;  %v78_v59 = vrot.slane %v77_v51, 1 }
   0xf   :  { %v44_v56 = vadd.f32 %v43_v48, %v42_v40  ;;  %v51_v57 = vadd.f32 %v50_v49, %v49_v41  ;;  %v84_v62 = vadd.f32 %v83_v54, %v82_v46  ;;  %v91_v63 = vadd.f32 %v90_v55, %v89_v47 }
  0x10   :  { %v58_v60 = vadd.f32 %v57_v52, %v56_v44  ;;  %v65_v61 = vadd.f32 %v64_v53, %v63_v45  ;;  %v72_v0 = vadd.f32 %v71_v58, %v70_v50  ;;  %v79_v1 = vadd.f32 %v78_v59, %v77_v51  ;;  %201 = vmatpush.bf16.msra.mxu1 %v232_v31 }
  0x11   :  { %v94_v2 = vpack.c.bf16 %v44_v56, %v44_v56  ;;  %v95_v3 = vpack.c.bf16 %v51_v57, %v51_v57  ;;  %v85_v4 = vrot.slane %v84_v62, 1  ;;  %v92_v5 = vrot.slane %v91_v63, 1 }
  0x12   :  { %v96_v6 = vpack.c.bf16 %v58_v60, %v58_v60  ;;  %v97_v7 = vpack.c.bf16 %v65_v61, %v65_v61  ;;  %v98_v8 = vpack.c.bf16 %v72_v0, %v72_v0  ;;  %v99_v9 = vpack.c.bf16 %v79_v1, %v79_v1 }
  0x13   :  { %v118_v10 = vunpack.c.l.b16 %v94_v2  ;;  %v119_v11 = vunpack.c.l.b16 %v95_v3  ;;  %v86_v12 = vadd.f32 %v85_v4, %v84_v62  ;;  %v93_v13 = vadd.f32 %v92_v5, %v91_v63 }
  0x14   :  { %v120_v14 = vunpack.c.l.b16 %v96_v6  ;;  %v121_v15 = vunpack.c.l.b16 %v97_v7  ;;  %v122_v16 = vunpack.c.l.b16 %v98_v8  ;;  %v123_v17 = vunpack.c.l.b16 %v99_v9 }
  0x15   :  { %v127_v18 = vsel %vm126_vm1, %v119_v11, %v118_v10  ;;  %v100_v19 = vpack.c.bf16 %v86_v12, %v86_v12  ;;  %v101_v20 = vpack.c.bf16 %v93_v13, %v93_v13  ;;  %vm138_vm7 = vcmask 1047559  }
  0x16   :  { %v129_v21 = vsel %vm128_vm2, %v120_v14, %v127_v18 }
  0x17   :  { %v131_v22 = vsel %vm130_vm3, %v121_v15, %v129_v21  ;;  %v124_v23 = vunpack.c.l.b16 %v100_v19  ;;  %v125_v24 = vunpack.c.l.b16 %v101_v20 }
  0x18   :  { %v133_v25 = vsel %vm132_vm4, %v122_v16, %v131_v22 }
  0x19   :  { %v135_v26 = vsel %vm134_vm5, %v123_v17, %v133_v25 }
  0x1a   :  { %v137_v27 = vsel %vm136_vm6, %v124_v23, %v135_v26 }
  0x1b   :  { %v139_v28 = vsel %vm138_vm7, %v125_v24, %v137_v27 }
  0x1c   :  { %v140_v29 = vpack.c.b16 %v139_v28, %v139_v28 }
  0x1e   :  { %220 = vmatmul.msk.bf16.vlgmr.msra.gmra.mxu0 %vm37_vm0, %v140_v29 }
  0x9b   :  { %v165_v33 = vpop.f32.mrf.mxu0 }
  0x9c   :  { %v166_v34 = vadd.f32 %v253_v32, %v165_v33 }
  0x9e   :  { %255 = vtanh.f32 %v166_v34 }
  0xa3   :  { %v167_v35 = vpop.f32.mrf.mxu0 }
  0xa4   :  { %v256_v36 = vpop.eup %255 }
  0xa5   :  { %v170_v37 = vpack.c.bf16 %v256_v36, %v256_v36 }
  0xa7   :  { %229 = vmatmul.msk.bf16.vlgmr.msra.gmra.mxu1 %vm37_vm0, %v170_v37 }
 0x124   :  { %v203_v39 = vpop.f32.mrf.mxu1 }
 0x125   :  { %v204_v40 = vadd.f32 %v254_v38, %v203_v39 }
 0x127   :  { %207 = vst [vmem:[%s338_s5] sm:$0xff] %v204_v40 }
 0x12c   :  { %v205_v41 = vpop.f32.mrf.mxu1 }

// kernel: pairwise_forward.2
= control target key start
LH: loop header
LB: loop body
LE: loop exit
PB: predicated region body
PF: predicated region fallthrough
CT: control target
= control target key end

     0   :  { %s748_s18 = smov 0   ;;  %s750_s19 = smov 0   ;;  %s848_s0 = inlined_call_operand.vmem [shape: bf16[8,3,8,32], index: 0, kind: input, shape index: {}]   ;;  %s849_s1 = inlined_call_operand.vmem [shape: bf16[32,32], index: 1, kind: input, shape index: {}]   ;;  %s850_s2 = inlined_call_operand.vmem [shape: f32[1,32], index: 2, kind: input, shape index: {}]   ;;  %s851_s3 = inlined_call_operand.vmem [shape: bf16[3,32,128], index: 3, kind: input, shape index: {}]   ;;  %s852_s4 = inlined_call_operand.vmem [shape: f32[1,128], index: 4, kind: input, shape index: {}]   ;;  %s853_s5 = inlined_call_operand.vmem [shape: f32[8,128], index: 5, kind: output, shape index: {}]  }
   0x1   :  { %s752_s20 = smov 0   ;;  %s754_s21 = smov 0  }
   0x2   :  { %s756_s22 = smov 0  }
   0x3 LB: > { %s24_s23 = sadd.s32 1, %s712_s21  ;;  %p43_p1 = scmp.ne.s32.totalorder %s704_s19, %s700_s18  ;;  %s716_s22 = sphi %s756_s22, %s15_s22   ;;  %s712_s21 = sphi %s754_s21, %s857_s21   ;;  %s708_s20 = sphi %s752_s20, %s856_s20   ;;  %s704_s19 = sphi %s750_s19, %s855_s19   ;;  %s700_s18 = sphi %s748_s18, %s854_s18  }
   0x4   : > { %p25_p0 = scmp.ge.s32.totalorder %s24_s23, 3  ;;  %p44_p2 = scmp.eq.s32.totalorder %s716_s22, 0 }
   0x5   : > { %s36_s25 = sadd.s32 1, %s704_s19  ;;  %p581_p5 = scmp.ge.s32.totalorder %s716_s22, 3 }
   0x6   : > { %s859_s23 = smov (%p25_p0, %s24_s23), 0  ;;  %p45_p3 = por %p44_p2, %p43_p1 }
   0x7   : > { %s32_s24 = ssub.s32 %s712_s21, %s859_s23  ;;  %191 = sbr.rel (%p581_p5) target bundleno = 24 (0x18), region = 32 }
   0x8   : > { %p34_p4 = scmp.eq.s32.totalorder %s32_s24, 0 }
   0xa   : > { %s783_s26 = scalar_select %p34_p4, %s704_s19, %s36_s25  }
   0xc   : > { %194 = sbr.rel (!%p45_p3) target bundleno = 24 (0x18), region = 36  ;;  %s196_s27 = sand.u32 (%p45_p3), 1, %s704_s19  }
   0xd   : > { %s583_s28 = sshll.u32 (%p45_p3), %s712_s21, 2  ;;  %s582_s29 = sshll.u32 (%p45_p3), %s196_s27, 5 }
   0xe   : > { %s203_s7 = scalar_lea.vmem (%p45_p3), %s848_s0, %s583_s28  ;;  %s198_s8 = scalar_lea.vmem (%p45_p3), [#allocation2], %s582_s29 }
   0xf   : > { %v220_v0 = vld [vmem:[%s203_s7] sm:$0xf] (%p45_p3)  ;;  %v222_v1 = vld [vmem:[%s203_s7 + $0xc] sm:$0xf] (%p45_p3)  ;;  %v224_v2 = vld [vmem:[%s203_s7 + $0x18] sm:$0xf] (%p45_p3) }
  0x10   : > { %221 = vst [vmem:[%s198_s8] sm:$0xf] (%p45_p3), %v220_v0  ;;  %v226_v3 = vld [vmem:[%s203_s7 + $0x24] sm:$0xf] (%p45_p3)  ;;  %v228_v4 = vld [vmem:[%s203_s7 + $0x30] sm:$0xf] (%p45_p3) }
  0x11   : > { %223 = vst [vmem:[%s198_s8 + $0x4] sm:$0xf] %v222_v1  ;;  %v230_v5 = vld [vmem:[%s203_s7 + $0x3c] sm:$0xf]  ;;  %v232_v6 = vld [vmem:[%s203_s7 + $0x48] sm:$0xf] }
  0x12   : > { %225 = vst [vmem:[%s198_s8 + $0x8] sm:$0xf] %v224_v2  ;;  %v234_v7 = vld [vmem:[%s203_s7 + $0x54] sm:$0xf] }
  0x13   : > { %227 = vst [vmem:[%s198_s8 + $0xc] sm:$0xf] %v226_v3 }
  0x14   : > { %229 = vst [vmem:[%s198_s8 + $0x10] sm:$0xf] %v228_v4 }
  0x15   : > { %231 = vst [vmem:[%s198_s8 + $0x14] sm:$0xf] %v230_v5 }
  0x16   : > { %233 = vst [vmem:[%s198_s8 + $0x18] sm:$0xf] %v232_v6 }
  0x17   : > { %235 = vst [vmem:[%s198_s8 + $0x1c] sm:$0xf] %v234_v7 }
  0x18 PF: > { %p584_p6 = scmp.ge.s32.totalorder %s716_s22, 1  ;;  %p274_p7 = scmp.lt.s32.totalorder %s716_s22, 4 }
  0x1a   : > { %p275_p8 = pnand %p584_p6, %p274_p7 }
  0x1b   : > { %s281_s9 = sand.u32 (!%p275_p8), 1, %s700_s18   ;;  %p586_p9 = scmp.ne.s32.totalorder (!%p275_p8), %s708_s20, 0 }
  0x1c   : > { %278 = sbr.rel (%p275_p8) target bundleno = 340 (0x154), region = 77  ;;  %s585_s10 = sshll.u32 (!%p275_p8), %s281_s9, 5 }
  0x1d   : > { %s283_s11 = scalar_lea.vmem (!%p275_p8), [#allocation2], %s585_s10 }
  0x21   : > { %316 = sbr.rel (%p586_p9) target bundleno = 40 (0x28), region = 85 }
  0x26   : > { %v674_v8 = vld [vmem:[%s852_s4] ss:$0 sm:$0xff] }
  0x27   : > { %321 = vst [vmem:[%s853_s5] sm:$0xff] %v674_v8 }
  0x28 PF: > { %v611_v9 = vld [vmem:[%s849_s1 + $0x8] sm:$0xff]  ;;  %v616_v10 = vld [vmem:[%s283_s11] sm:$0xff]   ;;  %vm338_vm0 = vcmask 261120   ;;  %v632_v14 = vld [vmem:[%s283_s11 + $0x10] sm:$0xff]   ;;  %vm427_vm1 = vcmask 1041409   ;;  %vm429_vm2 = vcmask 1042434  }
  0x29   : > { %v617_v11 = vunpack.c.l.bf16 %v616_v10  ;;  %v618_v12 = vunpack.c.h.bf16 %v616_v10  ;;  %v631_v13 = vld [vmem:[%s283_s11 + $0x8] sm:$0xff]   ;;  %v633_v15 = vld [vmem:[%s283_s11 + $0x18] sm:$0xff]   ;;  %463 = vmatpush.bf16.msra.mxu0 %v611_v9  ;;  %v610_v16 = vld [vmem:[%s849_s1] sm:$0xff]  ;;  %v625_v19 = vunpack.c.l.bf16 %v632_v14  ;;  %v626_v20 = vunpack.c.h.bf16 %v632_v14  ;;  %s612_s25 = sshll.u32 %s708_s20, 4 }
  0x2a   : > { %v621_v17 = vunpack.c.l.bf16 %v631_v13  ;;  %v622_v18 = vunpack.c.h.bf16 %v631_v13  ;;  %v629_v21 = vunpack.c.l.bf16 %v633_v15  ;;  %v630_v22 = vunpack.c.h.bf16 %v633_v15  ;;  %s475_s29 = scalar_lea.vmem %s851_s3, %s612_s25 }
  0x2b   : > { %v339_v23 = vsel %vm338_vm0, %v617_v11, 0.0  ;;  %v346_v24 = vsel %vm338_vm0, %v618_v12, 0.0  ;;  %v367_v31 = vsel %vm338_vm0, %v625_v19, 0.0  ;;  %v374_v32 = vsel %vm338_vm0, %v626_v20, 0.0 }
  0x2c   : > { %v340_v25 = vrot.slane %v339_v23, 4  ;;  %v347_v26 = vrot.slane %v346_v24, 4  ;;  %v353_v27 = vsel %vm338_vm0, %v621_v17, 0.0  ;;  %v360_v28 = vsel %vm338_vm0, %v622_v18, 0.0 }
  0x2d   : > { %v354_v29 = vrot.slane %v353_v27, 4  ;;  %v361_v30 = vrot.slane %v360_v28, 4  ;;  %464 = vmatpush.bf16.msra.mxu0 %v610_v16  ;;  %v368_v35 = vrot.slane %v367_v31, 4  ;;  %v375_v36 = vrot.slane %v374_v32, 4 }
  0x2e   : > { %v341_v33 = vadd.f32 %v340_v25, %v339_v23  ;;  %v348_v34 = vadd.f32 %v347_v26, %v346_v24  ;;  %v381_v39 = vsel %vm338_vm0, %v629_v21, 0.0  ;;  %v388_v40 = vsel %vm338_vm0, %v630_v22, 0.0 }
  0x2f   : > { %v355_v37 = vadd.f32 %v354_v29, %v353_v27  ;;  %v362_v38 = vadd.f32 %v361_v30, %v360_v28  ;;  %v369_v43 = vadd.f32 %v368_v35, %v367_v31  ;;  %v376_v44 = vadd.f32 %v375_v36, %v374_v32 }
  0x30   : > { %v342_v41 = vrot.slane %v341_v33, 2  ;;  %v349_v42 = vrot.slane %v348_v34, 2  ;;  %v382_v47 = vrot.slane %v381_v39, 4  ;;  %v389_v48 = vrot.slane %v388_v40, 4 }
  0x31   : > { %v356_v45 = vrot.slane %v355_v37, 2  ;;  %v363_v46 = vrot.slane %v362_v38, 2  ;;  %v370_v51 = vrot.slane %v369_v43, 2  ;;  %v377_v52 = vrot.slane %v376_v44, 2 }
  0x32   : > { %v343_v49 = vadd.f32 %v342_v41, %v341_v33  ;;  %v350_v50 = vadd.f32 %v349_v42, %v348_v34  ;;  %v383_v55 = vadd.f32 %v382_v47, %v381_v39  ;;  %v390_v56 = vadd.f32 %v389_v48, %v388_v40  ;;  %v614_v39 = vld [vmem:[%s475_s29 + $0x8] sm:$0xff]  ;;  %v613_v40 = vld [vmem:[%s475_s29] sm:$0xff] }
  0x33   : > { %v357_v53 = vadd.f32 %v356_v45, %v355_v37  ;;  %v364_v54 = vadd.f32 %v363_v46, %v362_v38  ;;  %vm431_vm3 = vcmask 1043459   ;;  %v371_v59 = vadd.f32 %v370_v51, %v369_v43  ;;  %501 = vmatpush.bf16.msra.mxu1 %v614_v39  ;;  %v675_v41 = vld [vmem:[%s850_s2] ss:$0 sm:$0xff] }
  0x34   : > { %v344_v57 = vrot.slane %v343_v49, 1  ;;  %v351_v58 = vrot.slane %v350_v50, 1  ;;  %v378_v60 = vadd.f32 %v377_v52, %v376_v44  ;;  %v384_v63 = vrot.slane %v383_v55, 2  ;;  %v471_v47 = vld [vmem:[%s853_s5] sm:$0xff] }
  0x35   : > { %v358_v61 = vrot.slane %v357_v53, 1  ;;  %v365_v62 = vrot.slane %v364_v54, 1  ;;  %v391_v0 = vrot.slane %v390_v56, 2  ;;  %v372_v3 = vrot.slane %v371_v59, 1 }
  0x36   : > { %v345_v1 = vadd.f32 %v344_v57, %v343_v49  ;;  %v352_v2 = vadd.f32 %v351_v58, %v350_v50  ;;  %v379_v4 = vrot.slane %v378_v60, 1  ;;  %v385_v7 = vadd.f32 %v384_v63, %v383_v55 }
  0x37   : > { %v359_v5 = vadd.f32 %v358_v61, %v357_v53  ;;  %v366_v6 = vadd.f32 %v365_v62, %v364_v54  ;;  %v392_v8 = vadd.f32 %v391_v0, %v390_v56  ;;  %v373_v9 = vadd.f32 %v372_v3, %v371_v59  ;;  %502 = vmatpush.bf16.msra.mxu1 %v613_v40 }
  0x38   : > { %v380_v10 = vadd.f32 %v379_v4, %v378_v60  ;;  %v395_v11 = vpack.c.bf16 %v345_v1, %v345_v1  ;;  %v396_v12 = vpack.c.bf16 %v352_v2, %v352_v2  ;;  %v386_v13 = vrot.slane %v385_v7, 1 }
  0x39   : > { %v393_v14 = vrot.slane %v392_v8, 1  ;;  %v397_v15 = vpack.c.bf16 %v359_v5, %v359_v5  ;;  %v398_v16 = vpack.c.bf16 %v366_v6, %v366_v6  ;;  %v399_v17 = vpack.c.bf16 %v373_v9, %v373_v9 }
  0x3a   : > { %v400_v18 = vpack.c.bf16 %v380_v10, %v380_v10  ;;  %v419_v19 = vunpack.c.l.b16 %v395_v11  ;;  %v420_v20 = vunpack.c.l.b16 %v396_v12  ;;  %v387_v21 = vadd.f32 %v386_v13, %v385_v7 }
  0x3b   : > { %v394_v22 = vadd.f32 %v393_v14, %v392_v8  ;;  %v421_v23 = vunpack.c.l.b16 %v397_v15  ;;  %v422_v24 = vunpack.c.l.b16 %v398_v16  ;;  %v423_v25 = vunpack.c.l.b16 %v399_v17 }
  0x3c   : > { %v424_v26 = vunpack.c.l.b16 %v400_v18  ;;  %v428_v27 = vsel %vm427_vm1, %v420_v20, %v419_v19  ;;  %vm433_vm4 = vcmask 1044484   ;;  %v401_v28 = vpack.c.bf16 %v387_v21, %v387_v21 }
  0x3d   : > { %v402_v29 = vpack.c.bf16 %v394_v22, %v394_v22  ;;  %v430_v30 = vsel %vm429_vm2, %v421_v23, %v428_v27  ;;  %vm435_vm5 = vcmask 1045509   ;;  %vm437_vm6 = vcmask 1046534  }
  0x3e   : > { %v432_v31 = vsel %vm431_vm3, %v422_v24, %v430_v30  ;;  %v425_v32 = vunpack.c.l.b16 %v401_v28  ;;  %vm439_vm7 = vcmask 1047559  }
  0x3f   : > { %v426_v33 = vunpack.c.l.b16 %v402_v29  ;;  %v434_v34 = vsel %vm433_vm4, %v423_v25, %v432_v31 }
  0x40   : > { %v436_v35 = vsel %vm435_vm5, %v424_v26, %v434_v34 }
  0x41   : > { %v438_v36 = vsel %vm437_vm6, %v425_v32, %v436_v35 }
  0x42   : > { %v440_v37 = vsel %vm439_vm7, %v426_v33, %v438_v36 }
  0x43   : > { %v441_v38 = vpack.c.b16 %v440_v37, %v440_v37 }
  0x45   : > { %595 = vmatmul.msk.bf16.vlgmr.msra.gmra.mxu0 %vm338_vm0, %v441_v38 }
  0xc2   : > { %v466_v42 = vpop.f32.mrf.mxu0 }
  0xc3   : > { %v467_v43 = vadd.f32 %v675_v41, %v466_v42 }
  0xc5   : > { %676 = vtanh.f32 %v467_v43 }
  0xca   : > { %v468_v44 = vpop.f32.mrf.mxu0 }
  0xcb   : > { %v677_v45 = vpop.eup %676 }
  0xcc   : > { %v472_v46 = vpack.c.bf16 %v677_v45, %v677_v45 }
  0xce   : > { %606 = vmatmul.msk.bf16.vlgmr.msra.gmra.mxu1 %vm338_vm0, %v472_v46 }
 0x14b   : > { %v504_v48 = vpop.f32.mrf.mxu1 }
 0x14c   : > { %v508_v49 = vadd.f32 %v504_v48, %v471_v47 }
 0x14e   : > { %509 = vst [vmem:[%s853_s5] sm:$0xff] %v508_v49 }
 0x153   : > { %v506_v50 = vpop.f32.mrf.mxu1 }
 0x154 PF: > { %s15_s22 = sadd.s32 1, %s716_s22   ;;  %s854_s18 = smov %s704_s19 }
 0x155   : > { %p12_p10 = scmp.ge.s32.totalorder %s15_s22, 5   ;;  %s855_s19 = smov %s783_s26 }
 0x156   : > { %s856_s20 = smov %s712_s21  ;;  %s857_s21 = smov %s859_s23 }
 0x157   :  { %14 = sbr.rel (!%p12_p10) target bundleno = 3 (0x3), region = 121 }

</bundles_post_ra>
